<compile_context>
chip_gen: v6e
topology: v6e:2x2x1
jax: 0.10.0
libtpu: 0.0.40
codegen_flags: <defaults>
</compile_context>

<pallas_src>
import functools

import jax
import jax.numpy as jnp
from jax import lax
from jax.experimental import pallas as pl
from jax.experimental.pallas import tpu as pltpu


def _focal_loss_kernel(x_ref, t_ref, out_ref, acc_ref, *,
                       gamma, ignore_index, n_rows, block_rows):
    i = pl.program_id(0)

    @pl.when(i == 0)
    def _init():
        acc_ref[0] = 0.0
        acc_ref[1] = 0.0

    x = x_ref[...].astype(jnp.float32)        # [TN, C]
    t = t_ref[...]                            # [TN, 1] int32
    tn, c = x.shape

    # Rows past the true N (partial final block) hold stale buffer data; mask
    # them out by global row index.  Combined with the ignore_index mask.
    row_ids = i * block_rows + lax.broadcasted_iota(jnp.int32, (tn, 1), 0)
    valid = jnp.logical_and(row_ids < n_rows, t != ignore_index)   # [TN, 1] bool

    # --- numerically stable log-softmax pieces (one exp per element) ---
    m = jnp.max(x, axis=1, keepdims=True)     # [TN, 1]
    z = x - m                                 # [TN, C]
    lse = jnp.log(jnp.sum(jnp.exp(z), axis=1, keepdims=True))   # [TN, 1]

    # --- gather z[row, target[row]] via a select (no dynamic gather on TPU) ---
    col_ids = lax.broadcasted_iota(jnp.int32, (tn, c), 1)
    z_t = jnp.sum(jnp.where(col_ids == t, z, 0.0), axis=1, keepdims=True)  # [TN,1]

    # --- focal modulation only on the gathered [TN, 1] column ---
    log_pt_t = z_t - lse                      # == log_softmax(x)[row, target]
    pt_t = jnp.exp(log_pt_t)
    one_minus = jnp.maximum(1.0 - pt_t, 0.0)  # clamp against rounding above 1
    if gamma == 2.0:
        mod = one_minus * one_minus           # fast path: VPU multiply, no pow
    elif gamma == 1.0:
        mod = one_minus
    elif gamma == 0.0:
        mod = jnp.ones_like(one_minus)
    else:
        mod = one_minus ** gamma
    # jnp.where (not multiply-by-mask) so garbage/NaN rows cannot poison sums.
    per_row = jnp.where(valid, -(mod * log_pt_t), 0.0)            # [TN, 1]

    acc_ref[0] += jnp.sum(per_row)
    acc_ref[1] += jnp.sum(valid.astype(jnp.float32))

    @pl.when(i == pl.num_programs(0) - 1)
    def _finalize():
        out_ref[0, 0] = acc_ref[0] / acc_ref[1]


def _round_up(v, m):
    return ((v + m - 1) // m) * m


def focal_loss(x, target, *, gamma=2.0, ignore_index=-100, block_rows=None):
    """x: [N, C] float (f32 or bf16), target: [N] int -> scalar float32."""
    n, c = x.shape
    itemsize = jnp.dtype(x.dtype).itemsize

    if block_rows is None:
        # ~4 MiB per logits buffer: fits v5e/v6e/v7x default scoped VMEM with
        # double buffering, large enough to amortize per-step overhead.
        row_bytes = max(c * itemsize, 1)
        block_rows = max(8, (4 * 1024 * 1024) // row_bytes)
    gran = 8 if itemsize >= 4 else 16          # sublane granularity (packed dtypes)
    block_rows = max(gran, (int(block_rows) // gran) * gran)
    block_rows = min(block_rows, _round_up(n, gran))

    num_blocks = pl.cdiv(n, block_rows)        # partial last block handled in-kernel
    t2 = target.astype(jnp.int32).reshape(n, 1)

    kernel = functools.partial(
        _focal_loss_kernel,
        gamma=float(gamma),
        ignore_index=int(ignore_index),
        n_rows=int(n),
        block_rows=int(block_rows),
    )

    cost = pl.CostEstimate(
        flops=6 * n * c,
        transcendentals=n * c + 3 * n,
        bytes_accessed=n * c * itemsize + n * 4 + 4,
    )

    out = pl.pallas_call(
        kernel,
        out_shape=jax.ShapeDtypeStruct((1, 1), jnp.float32),
        grid=(num_blocks,),
        in_specs=[
            # logits row-tile; C kept full/last so lanes stay dense
            pl.BlockSpec((block_rows, c), lambda i: (i, 0)),
            # per-row target column (lane-padded but tiny relative to logits)
            pl.BlockSpec((block_rows, 1), lambda i: (i, 0)),
        ],
        out_specs=pl.BlockSpec(memory_space=pltpu.MemorySpace.SMEM),
        scratch_shapes=[pltpu.SMEM((2,), jnp.float32)],   # [loss_sum, count]
        compiler_params=pltpu.CompilerParams(
            dimension_semantics=("arbitrary",),           # sequential accumulator
        ),
        cost_estimate=cost,
    )(x, t2)
    return out[0, 0]


def _focal_loss_ref(x, target, *, gamma=2.0, ignore_index=-100):
    """Pure-JAX reference mirroring the PyTorch forward."""
    log_pt = jax.nn.log_softmax(x.astype(jnp.float32), axis=1)
    pt = jnp.exp(log_pt)
    log_pt = ((1.0 - pt) ** gamma) * log_pt
    n = x.shape[0]
    valid = target != ignore_index
    safe_t = jnp.where(valid, target, 0)
    picked = log_pt[jnp.arange(n), safe_t]
    per_sample = jnp.where(valid, -picked, 0.0)
    return jnp.sum(per_sample) / jnp.sum(valid.astype(jnp.float32))


if __name__ == "__main__":
    key = jax.random.PRNGKey(0)
    k1, k2 = jax.random.split(key)

    # Small shapes consistent with the module: input [N, C], target [N].
    # N=13 with block_rows=8 exercises the partial boundary block AND a
    # multi-step grid (grid=(2,)) so the SMEM accumulator init/accumulate/
    # finalize path and the in-kernel row masking both run.
    N, C = 13, 32
    x = jax.random.normal(k1, (N, C), dtype=jnp.float32)
    target = jax.random.randint(k2, (N,), 0, C, dtype=jnp.int32)
    target = target.at[3].set(-100)   # exercise ignore_index handling

    ref = _focal_loss_ref(x, target, gamma=2.0, ignore_index=-100)

    # Multi-block grid with a partial final block.
    out_multi = focal_loss(x, target, gamma=2.0, ignore_index=-100, block_rows=8)
    out_multi = jax.block_until_ready(out_multi)
    assert jnp.allclose(out_multi, ref, atol=1e-5, rtol=1e-5), (out_multi, ref)

    # Default (auto) tile size -> single partial block.
    out_auto = focal_loss(x, target, gamma=2.0, ignore_index=-100)
    out_auto = jax.block_until_ready(out_auto)
    assert jnp.allclose(out_auto, ref, atol=1e-5, rtol=1e-5), (out_auto, ref)

    print("KERNEL_OK")
</pallas_src>

<mosaic_0001>
module attributes {stable_mosaic.version = 11 : i64} {
  func.func @_focal_loss_kernel(%arg0: i32, %arg1: memref<8x32xf32, #tpu.memory_space<vmem>>, %arg2: memref<8x1xi32, #tpu.memory_space<vmem>>, %arg3: memref<1x1xf32, #tpu.memory_space<smem>>, %arg4: memref<2xf32, #tpu.memory_space<smem>>) attributes {dimension_semantics = [#tpu.dimension_semantics<arbitrary>], iteration_bounds = array<i64: 2>, scalar_prefetch = 0 : i64, scratch_operands = 1 : i64, tpu.core_type = #tpu.core_type<tc>, window_params = [{transform_indices = @transform_0, window_bounds = array<i64: 8, 32>}, {transform_indices = @transform_1, window_bounds = array<i64: 8, 1>}, {transform_indices = @transform_2, window_bounds = array<i64: 1, 1>}]} {
    %c0_i32 = arith.constant 0 : i32
    %0 = arith.cmpi eq, %arg0, %c0_i32 : i32
    %1 = arith.extui %0 : i1 to i32
    %c0_i32_0 = arith.constant 0 : i32
    %2 = arith.cmpi ne, %1, %c0_i32_0 : i32
    scf.if %2 {
      %cst_17 = arith.constant 0.000000e+00 : f32
      %c0_18 = arith.constant 0 : index
      %60 = memref.load %arg4[%c0_18] : memref<2xf32, #tpu.memory_space<smem>>
      memref.store %cst_17, %arg4[%c0_18] : memref<2xf32, #tpu.memory_space<smem>>
      %cst_19 = arith.constant 0.000000e+00 : f32
      %c1_20 = arith.constant 1 : index
      %61 = memref.load %arg4[%c1_20] : memref<2xf32, #tpu.memory_space<smem>>
      memref.store %cst_19, %arg4[%c1_20] : memref<2xf32, #tpu.memory_space<smem>>
    } else {
    }
    %c0 = arith.constant 0 : index
    %c0_1 = arith.constant 0 : index
    %3 = vector.load %arg1[%c0, %c0_1] : memref<8x32xf32, #tpu.memory_space<vmem>>, vector<8x32xf32>
    %c0_2 = arith.constant 0 : index
    %c0_3 = arith.constant 0 : index
    %4 = vector.load %arg2[%c0_2, %c0_3] : memref<8x1xi32, #tpu.memory_space<vmem>>, vector<8x1xi32>
    %c8_i32 = arith.constant 8 : i32
    %5 = arith.muli %arg0, %c8_i32 : i32
    %6 = tpu.iota {dimensions = array<i32: 0>} : vector<8x1xi32>
    %7 = vector.broadcast %5 : i32 to vector<8x1xi32>
    %8 = arith.addi %7, %6 : vector<8x1xi32>
    %c13_i32 = arith.constant 13 : i32
    %9 = vector.broadcast %c13_i32 : i32 to vector<8x1xi32>
    %10 = arith.cmpi slt, %8, %9 : vector<8x1xi32>
    %c-100_i32 = arith.constant -100 : i32
    %11 = vector.broadcast %c-100_i32 : i32 to vector<8x1xi32>
    %12 = arith.cmpi ne, %4, %11 : vector<8x1xi32>
    %13 = arith.andi %10, %12 : vector<8x1xi1>
    %cst = arith.constant dense<0xFF800000> : vector<8xf32>
    %14 = vector.multi_reduction <maximumf>, %3, %cst [1] : vector<8x32xf32> to vector<8xf32>
    %15 = vector.shape_cast %14 : vector<8xf32> to vector<8x1xf32>
    %16 = vector.broadcast %15 : vector<8x1xf32> to vector<8x32xf32>
    %17 = arith.subf %3, %16 : vector<8x32xf32>
    %18 = math.exp %17 : vector<8x32xf32>
    %cst_4 = arith.constant dense<0.000000e+00> : vector<8xf32>
    %19 = vector.multi_reduction <add>, %18, %cst_4 [1] : vector<8x32xf32> to vector<8xf32>
    %20 = vector.shape_cast %19 : vector<8xf32> to vector<8x1xf32>
    %21 = math.log %20 : vector<8x1xf32>
    %22 = tpu.iota {dimensions = array<i32: 1>} : vector<8x32xi32>
    %23 = vector.broadcast %4 : vector<8x1xi32> to vector<8x32xi32>
    %24 = arith.cmpi eq, %22, %23 : vector<8x32xi32>
    %cst_5 = arith.constant 0.000000e+00 : f32
    %25 = vector.broadcast %cst_5 : f32 to vector<8x32xf32>
    %26 = arith.select %24, %17, %25 : vector<8x32xi1>, vector<8x32xf32>
    %cst_6 = arith.constant dense<0.000000e+00> : vector<8xf32>
    %27 = vector.multi_reduction <add>, %26, %cst_6 [1] : vector<8x32xf32> to vector<8xf32>
    %28 = vector.shape_cast %27 : vector<8xf32> to vector<8x1xf32>
    %29 = arith.subf %28, %21 : vector<8x1xf32>
    %30 = math.exp %29 : vector<8x1xf32>
    %cst_7 = arith.constant 1.000000e+00 : f32
    %31 = vector.broadcast %cst_7 : f32 to vector<8x1xf32>
    %32 = arith.subf %31, %30 : vector<8x1xf32>
    %cst_8 = arith.constant 0.000000e+00 : f32
    %33 = vector.broadcast %cst_8 : f32 to vector<8x1xf32>
    %34 = arith.maximumf %32, %33 : vector<8x1xf32>
    %35 = arith.mulf %34, %34 : vector<8x1xf32>
    %36 = arith.mulf %35, %29 : vector<8x1xf32>
    %cst_9 = arith.constant 0.000000e+00 : f32
    %37 = vector.broadcast %cst_9 : f32 to vector<8x1xf32>
    %38 = arith.subf %37, %36 : vector<8x1xf32>
    %cst_10 = arith.constant 0.000000e+00 : f32
    %39 = vector.broadcast %cst_10 : f32 to vector<8x1xf32>
    %40 = arith.select %13, %38, %39 : vector<8x1xi1>, vector<8x1xf32>
    %c0_11 = arith.constant 0 : index
    %41 = memref.load %arg4[%c0_11] : memref<2xf32, #tpu.memory_space<smem>>
    %42 = vector.shape_cast %40 : vector<8x1xf32> to vector<1x8x1xf32>
    %cst_12 = arith.constant dense<0.000000e+00> : vector<1xf32>
    %43 = vector.multi_reduction <add>, %42, %cst_12 [1, 2] : vector<1x8x1xf32> to vector<1xf32>
    %44 = vector.shape_cast %43 : vector<1xf32> to vector<1x1x1xf32>
    %45 = vector.extract %44[0, 0, 0] : f32 from vector<1x1x1xf32>
    %46 = arith.addf %41, %45 : f32
    %c0_13 = arith.constant 0 : index
    %47 = memref.load %arg4[%c0_13] : memref<2xf32, #tpu.memory_space<smem>>
    memref.store %46, %arg4[%c0_13] : memref<2xf32, #tpu.memory_space<smem>>
    %c1 = arith.constant 1 : index
    %48 = memref.load %arg4[%c1] : memref<2xf32, #tpu.memory_space<smem>>
    %49 = arith.extui %13 : vector<8x1xi1> to vector<8x1xi32>
    %50 = arith.sitofp %49 : vector<8x1xi32> to vector<8x1xf32>
    %51 = vector.shape_cast %50 : vector<8x1xf32> to vector<1x8x1xf32>
    %cst_14 = arith.constant dense<0.000000e+00> : vector<1xf32>
    %52 = vector.multi_reduction <add>, %51, %cst_14 [1, 2] : vector<1x8x1xf32> to vector<1xf32>
    %53 = vector.shape_cast %52 : vector<1xf32> to vector<1x1x1xf32>
    %54 = vector.extract %53[0, 0, 0] : f32 from vector<1x1x1xf32>
    %55 = arith.addf %48, %54 : f32
    %c1_15 = arith.constant 1 : index
    %56 = memref.load %arg4[%c1_15] : memref<2xf32, #tpu.memory_space<smem>>
    memref.store %55, %arg4[%c1_15] : memref<2xf32, #tpu.memory_space<smem>>
    %c1_i32 = arith.constant 1 : i32
    %57 = arith.cmpi eq, %arg0, %c1_i32 : i32
    %58 = arith.extui %57 : i1 to i32
    %c0_i32_16 = arith.constant 0 : i32
    %59 = arith.cmpi ne, %58, %c0_i32_16 : i32
    scf.if %59 {
      %c0_17 = arith.constant 0 : index
      %60 = memref.load %arg4[%c0_17] : memref<2xf32, #tpu.memory_space<smem>>
      %c1_18 = arith.constant 1 : index
      %61 = memref.load %arg4[%c1_18] : memref<2xf32, #tpu.memory_space<smem>>
      %62 = arith.divf %60, %61 : f32
      %c0_19 = arith.constant 0 : index
      %c0_20 = arith.constant 0 : index
      %63 = memref.load %arg3[%c0_19, %c0_20] : memref<1x1xf32, #tpu.memory_space<smem>>
      memref.store %62, %arg3[%c0_19, %c0_20] : memref<1x1xf32, #tpu.memory_space<smem>>
    } else {
    }
    return
  }
  func.func @transform_0(%arg0: i32) -> (i32, i32) {
    %c0_i32 = arith.constant 0 : i32
    %c0_i32_0 = arith.constant 0 : i32
    return %arg0, %c0_i32 : i32, i32
  }
  func.func @transform_1(%arg0: i32) -> (i32, i32) {
    %c0_i32 = arith.constant 0 : i32
    %c0_i32_0 = arith.constant 0 : i32
    return %arg0, %c0_i32 : i32, i32
  }
  func.func @transform_2(%arg0: i32) -> (i32, i32) {
    %c0_i32 = arith.constant 0 : i32
    %c0_i32_0 = arith.constant 0 : i32
    %c0_i32_1 = arith.constant 0 : i32
    return %c0_i32, %c0_i32_0 : i32, i32
  }
}

</mosaic_0001>

<bundles_post_ra>
// kernel: tpu_custom_call.1
= control target key start
LH: loop header
LB: loop body
LE: loop exit
PB: predicated region body
PF: predicated region fallthrough
CT: control target
= control target key end

     0   :  { %7 = vsyncpa [#allocation4], 0  ;;  %s387_s9 = smov 0   ;;  %s418_s0 = inlined_call_operand.vmem [shape: f32[13,32], index: 0, kind: input, shape index: {}]   ;;  %s419_s1 = inlined_call_operand.vmem [shape: s32[13,1], index: 1, kind: input, shape index: {}]   ;;  %s420_s2 = inlined_call_operand.hbm [shape: f32[1,1], index: 2, kind: output, shape index: {}]  }
   0x1 LB: > { %s393_s10 = sadd.s32 4294967295, %s366_s9   ;;  %p296_p0 = scmp.ge.s32.totalorder %s366_s9, 1  ;;  %s366_s9 = sphi %s387_s9, %s13_s9  }
   0x2   : > { %p116_p1 = scmp.lt.s32.totalorder %s366_s9, 3 }
   0x4   : > { %p117_p2 = pnand %p296_p0, %p116_p1 }
   0x5   : > { %p136_p3 = scmp.lt.s32.totalorder (!%p117_p2), %s393_s10, 1  ;;  %s300_s19 = sshll.u32 (!%p117_p2), %s393_s10, 3 }
   0x6   : > { %120 = sbr.rel (%p117_p2) target bundleno = 645 (0x285), region = 28  ;;  %p322_p4 = scmp.eq.s32.totalorder (!%p117_p2), %s393_s10, 0 }
   0x7   : > { %s370_s20 = smov (!%p117_p2), 0.0   ;;  %p303_p5 = scmp.ne.s32.totalorder (!%p117_p2), %s393_s10, 1 }
   0xb   : > { %v368_v0 = vmov 0   ;;  %s137_s11 = scalar_select %p136_p3, %s393_s10, 1  ;;  %vm162_vm0 = vcmask 261120   ;;  %v155_v7 = vlaneseq  ;;  %v157_v21 = vstv %s300_s19 }
   0xc   : > { %337 = vset.pattern.permute.xlu0 %v368_v0  ;;  %vm194_vm5 = vcmask 7168   ;;  %v369_v30 = vmov 0.0   ;;  %316 = sst [smem:[#allocation2]] (%p322_p4), %s370_s20 }
   0xd   : > { %s297_s12 = sshll.u32 %s137_s11, 3  ;;  %v175_v8 = vand.u32 127, %v155_v7  ;;  %v156_v20 = vshrl.u32 %v155_v7, 7  ;;  %317 = sst [smem:[#allocation2 + $0x1]] (%p322_p4), %s370_s20 }
   0xe   : > { %s139_s15 = scalar_lea.vmem %s418_s0, %s297_s12  ;;  %s143_s18 = scalar_lea.vmem %s419_s1, %s297_s12 }
   0xf   : > { %v152_v1 = vld [vmem:[%s139_s15] sm:$0xff]  ;;  %v158_v24 = vadd.s32 %v157_v21, %v156_v20  ;;  %s193_s21 = sld [smem:[#allocation2]] }
  0x10   : > { %v163_v2 = vsel %vm162_vm0, %v152_v1, -inf  ;;  %v153_v3 = vld [vmem:[%s143_s18] sm:$0xff]  ;;  %s301_s22 = sld [smem:[#allocation2 + $0x1]] }
  0x11   : > { %164 = vmax.xlane.f32.xlu0 %v163_v2  ;;  %vm160_vm2 = vcmp.ne.s32.totalorder %v153_v3, 4294967196  ;;  %vm159_vm3 = vcmp.lt.s32.totalorder %v158_v24, 13 }
  0x12   : > { %vm161_vm4 = vmand %vm159_vm3, %vm160_vm2 }
  0x13   : > { %v302_v31 = vsel %vm161_vm4, 1.0, %v369_v30 }
  0x14   : > { %v211_v33 = vsel %vm194_vm5, %v302_v31, 0.0 }
  0x27   : > { %177 = vperm.xlu0 %337, %v153_v3  }
  0x9a   : > { %v165_v4 = vpop.xlane.xlu0 %164 }
  0x9b   : > { %v166_v5 = vsub.f32 %v152_v1, %v165_v4 }
  0x9d   : > { %v167_v6 = vmul.f32 1.442695, %v166_v5 }
  0x9f   : > { %338 = vpow2.f32 %v167_v6 }
  0xa2   : > { %v178_v9 = vpop.permute.xlu0 %177 }
  0xa3   : > { %vm179_vm1 = vcmp.eq.s32.totalorder %v175_v8, %v178_v9 }
  0xa4   : > { %v180_v12 = vsel %vm179_vm1, %v166_v5, 0.0 }
  0xa5   : > { %v181_v13 = vsel %vm162_vm0, %v180_v12, 0.0 }
  0xac   : > { %v339_v10 = vpop.eup %338 }
  0xad   : > { %v169_v11 = vsel %vm162_vm0, %v339_v10, 0.0 }
  0xae   : > { %170 = vadd.xlane.f32.xlu1 %v169_v11 }
  0xb2   : > { %182 = vadd.xlane.f32.xlu1 %v181_v13 }
 0x137   : > { %v171_v14 = vpop.xlane.xlu1 %170 }
 0x138   : > { %340 = vlog2.f32 %v171_v14 }
 0x13b   : > { %v183_v17 = vpop.xlane.xlu1 %182 }
 0x145   : > { %v341_v15 = vpop.eup %340 }
 0x146   : > { %v173_v16 = vmul.f32 0.6931472, %v341_v15 }
 0x148   : > { %v184_v18 = vsub.f32 %v183_v17, %v173_v16 }
 0x14a   : > { %v185_v19 = vmul.f32 1.442695, %v184_v18 }
 0x14c   : > { %342 = vpow2.f32 %v185_v19 }
 0x159   : > { %v343_v22 = vpop.eup %342 }
 0x15a   : > { %v187_v23 = vsub.f32 1.0, %v343_v22 }
 0x15c   : > { %v188_v25 = vmax.f32 %v187_v23, 0.0 }
 0x15e   : > { %v189_v26 = vmul.f32 %v188_v25, %v188_v25 }
 0x160   : > { %v190_v27 = vmul.f32 %v189_v26, %v184_v18 }
 0x162   : > { %v191_v28 = vsub.f32 0.0, %v190_v27 }
 0x164   : > { %v192_v29 = vsel %vm161_vm4, %v191_v28, 0.0 }
 0x165   : > { %v195_v32 = vsel %vm194_vm5, %v192_v29, 0.0 }
 0x166   : > { %196 = vadd.xlane.f32.xlu1 %v195_v32 }
 0x16a   : > { %212 = vadd.xlane.f32.xlu1 %v211_v33 }
 0x1ef   : > { %v197_v34 = vpop.xlane.xlu1 %196 }
 0x1f0   : > { %v198_v35 = vrot.slane %v197_v34, 4 }
 0x1f2   : > { %v199_v36 = vadd.f32 %v198_v35, %v197_v34 }
 0x1f3   : > { %v213_v37 = vpop.xlane.xlu1 %212 }
 0x1f4   : > { %v200_v38 = vrot.slane %v199_v36, 2  ;;  %v214_v39 = vrot.slane %v213_v37, 4 }
 0x1f6   : > { %v215_v40 = vadd.f32 %v214_v39, %v213_v37  ;;  %v201_v41 = vadd.f32 %v200_v38, %v199_v36 }
 0x1f8   : > { %v216_v42 = vrot.slane %v215_v40, 2  ;;  %v202_v43 = vrot.slane %v201_v41, 1 }
 0x1fa   : > { %v217_v44 = vadd.f32 %v216_v42, %v215_v40  ;;  %v203_v45 = vadd.f32 %v202_v43, %v201_v41 }
 0x1fc   : > { %309 = vpush %v203_v45  ;;  %v218_v46 = vrot.slane %v217_v44, 1 }
 0x1fe   : > { %v219_v47 = vadd.f32 %v218_v46, %v217_v44 }
 0x200   : > { %311 = vpush %v219_v47 }
 0x22d   : > { %s310_s23 = spop %309 }
 0x22e   : > { %s205_s24 = sadd.f32 %s310_s23, %s193_s21 }
 0x230   : > { %207 = sst [smem:[#allocation2]] %s205_s24  ;;  %227 = sbr.rel (%p303_p5) target bundleno = 639 (0x27f), region = 36 }
 0x231   : > { %s312_s25 = spop %311  ;;  %s228_s28 = sld [smem:[#allocation2]] (!%p303_p5) }
 0x232   : > { %s221_s26 = sadd.f32 %s312_s25, %s301_s22 }
 0x234   : > { %223 = sst [smem:[#allocation2 + $0x1]] %s221_s26 }
 0x235   : > { %s304_s27 = sld [smem:[#allocation2 + $0x1]] }
 0x23b   : > { %v230_v48 = vstv %s304_s27 }
 0x23c   : > { %344 = vrcp.f32 %v230_v48 }
 0x249   : > { %v345_v49 = vpop.eup %344 }
 0x24a   : > { %313 = vpush %v345_v49 }
 0x27b   : > { %s314_s29 = spop %313 }
 0x27c   : > { %s233_s30 = smul.f32 %s314_s29, %s228_s28 }
 0x27e   : > { %235 = sst [smem:[#allocation3]] %s233_s30 }
 0x27f PF: > { %p323_p6 = scmp.eq.s32.totalorder %s393_s10, 1  ;;  %s371_s3 = smov [#allocation3]  }
 0x281   : > { %319 = dma.smem_to_hbm (%p323_p6), %s371_s3, 16, %s420_s2, [#allocation4]  }
 0x282   : > { %361 = dma.done.wait (%p323_p6), [#allocation4], 16  }
 0x283   : > { %363 = vsyncadd (%p323_p6), [#allocation4], 4294967280 }
 0x284   : > { %249 = sfence }
 0x285 PF: > { %s13_s9 = sadd.s32 1, %s366_s9  }
 0x286   : > { %p10_p7 = scmp.ge.s32.totalorder %s13_s9, 4  }
 0x288   :  { %12 = sbr.rel (!%p10_p7) target bundleno = 1 (0x1), region = 71 }
 0x28d   :  { %255 = vsyncpa [#allocation4], 1 }
 0x28e   :  { %257 = vsyncpa [#allocation4 + $0x1], 1 }

</bundles_post_ra>
